<compile_context>
chip_gen: v7x
topology: tpu7x:2x2x1
jax: 0.10.0
libtpu: 0.0.40
codegen_flags: <defaults>
</compile_context>

<pallas_src>
import functools

import jax
import jax.numpy as jnp
from jax.experimental import pallas as pl
from jax.experimental.pallas import tpu as pltpu

LN_EPS = 1e-12  # ALBERT LayerNorm epsilon


# ---------------------------------------------------------------- kernels ---

def fused_context_kernel(x_ref, mflat_ref, mnorm_ref, avg_ref, seg_ref,
                         gamma_ref, beta_ref, wc_ref, bc_ref,
                         w1e_ref, w1c_ref, b1_ref, w2_ref, b2_ref,
                         o_ref, *, mm_dtype):
    """One support group per grid step; everything VMEM-resident.

    x_ref     : (1, sup*W, E)  summed (pre-LayerNorm) embeddings
    mflat_ref : (1, sup*W, 1)  normalized attention mask, flattened rows
    mnorm_ref : (1, sup, W)    normalized attention mask per sample
    avg_ref   : (W, sup*W)     constant support-averaging matrix
    seg_ref   : (sup, sup*W)   constant per-sample segment-sum matrix
    """
    def mm(a, b):
        return jnp.dot(a.astype(mm_dtype), b.astype(mm_dtype),
                       preferred_element_type=jnp.float32)

    # ---- ALBERT embedding LayerNorm (f32 statistics) ----
    x = x_ref[0]                                        # (sup*W, E)
    mu = jnp.mean(x, axis=-1, keepdims=True)
    var = jnp.mean((x - mu) ** 2, axis=-1, keepdims=True)
    e = (x - mu) * jax.lax.rsqrt(var + LN_EPS) * gamma_ref[...] + beta_ref[...]

    # ---- ContextNet: per-token Linear + tanh ----
    ctx = jnp.tanh(mm(e, wc_ref[...]) + bc_ref[...])    # (sup*W, Ch)

    # ---- support mean over the support dimension (== avg_ref @ ctx) ----
    mean_ctx = mm(avg_ref[...], ctx)                    # (W, Ch)

    # ---- PredictionNet: masked mean pooling (mask pre-normalized) ----
    pooled_e = mm(seg_ref[...], e * mflat_ref[0])       # (sup, E)
    pooled_c = mm(mnorm_ref[0], mean_ctx)               # (sup, Ch)  (repeat+pool)

    # concat([pooled_e, pooled_c]) @ w1 == pooled_e@w1[:E] + pooled_c@w1[E:]
    h = jnp.maximum(mm(pooled_e, w1e_ref[...]) + mm(pooled_c, w1c_ref[...])
                    + b1_ref[...], 0.0)
    o_ref[0] = mm(h, w2_ref[...]) + b2_ref[...]         # (sup, O)


def fused_nocontext_kernel(x_ref, mflat_ref, seg_ref, gamma_ref, beta_ref,
                           w1_ref, b1_ref, w2_ref, b2_ref, o_ref, *, mm_dtype):
    def mm(a, b):
        return jnp.dot(a.astype(mm_dtype), b.astype(mm_dtype),
                       preferred_element_type=jnp.float32)

    x = x_ref[...]                                      # (B*W, E)
    mu = jnp.mean(x, axis=-1, keepdims=True)
    var = jnp.mean((x - mu) ** 2, axis=-1, keepdims=True)
    e = (x - mu) * jax.lax.rsqrt(var + LN_EPS) * gamma_ref[...] + beta_ref[...]

    pooled = mm(seg_ref[...], e * mflat_ref[...])       # (B, E)
    h = jnp.maximum(mm(pooled, w1_ref[...]) + b1_ref[...], 0.0)
    o_ref[...] = mm(h, w2_ref[...]) + b2_ref[...]


# ----------------------------------------------------------- full forward ---

def contextual_net_forward(sentence, attention_mask, raw_x, params,
                           support_size, use_context=True,
                           matmul_dtype=jnp.float32):
    # TODO(synk): raw_x is forwarded to the injected PredictionNet in the
    # reference; the synthetic PredictionNet here does not consume it.
    del raw_x
    B, W = sentence.shape
    E = params["word_emb"].shape[1]

    # ALBERT-style embedding sum (gather stays in XLA).
    # TODO(synk): at realistic ALBERT sizes this gather could be fused into
    # the Pallas kernel via scalar-prefetched token ids + Element row gather.
    summed = (jnp.take(params["word_emb"], sentence, axis=0)
              + params["pos_emb"][None, :W, :]
              + params["tok_type_emb"][0][None, None, :]).astype(jnp.float32)

    mask_f = attention_mask.astype(jnp.float32)                       # (B, W)
    msum = jnp.maximum(jnp.sum(mask_f, axis=1, keepdims=True), 1.0)   # (B, 1)
    mnorm = mask_f / msum                                             # (B, W)

    cparams = pltpu.CompilerParams(
        dimension_semantics=("parallel",),
        vmem_limit_bytes=32 * 1024 * 1024,
    )

    if use_context:
        if B % support_size == 0:
            meta_B, sup = B // support_size, support_size
        else:
            meta_B, sup = 1, B
        Ch = params["w_ctx"].shape[1]
        H = params["w1"].shape[1]
        O = params["w2"].shape[1]

        x = summed.reshape(meta_B, sup * W, E)
        mflat = mnorm.reshape(meta_B, sup * W, 1)
        mnorm_g = mnorm.reshape(meta_B, sup, W)
        # constant matrices (mask-independent):
        avg_mat = jnp.tile(jnp.eye(W, dtype=jnp.float32) / float(sup), (1, sup))
        seg_sum = jnp.repeat(jnp.eye(sup, dtype=jnp.float32), W, axis=1)
        w1e = params["w1"][:E]          # split-K: embeds part of concat
        w1c = params["w1"][E:]          # split-K: context part of concat

        kernel = functools.partial(fused_context_kernel, mm_dtype=matmul_dtype)
        out = pl.pallas_call(
            kernel,
            out_shape=jax.ShapeDtypeStruct((meta_B, sup, O), jnp.float32),
            grid=(meta_B,),
            in_specs=[
                pl.BlockSpec((1, sup * W, E), lambda g: (g, 0, 0)),
                pl.BlockSpec((1, sup * W, 1), lambda g: (g, 0, 0)),
                pl.BlockSpec((1, sup, W), lambda g: (g, 0, 0)),
                pl.BlockSpec((W, sup * W), lambda g: (0, 0)),
                pl.BlockSpec((sup, sup * W), lambda g: (0, 0)),
                pl.BlockSpec((1, E), lambda g: (0, 0)),
                pl.BlockSpec((1, E), lambda g: (0, 0)),
                pl.BlockSpec((E, Ch), lambda g: (0, 0)),
                pl.BlockSpec((1, Ch), lambda g: (0, 0)),
                pl.BlockSpec((E, H), lambda g: (0, 0)),
                pl.BlockSpec((Ch, H), lambda g: (0, 0)),
                pl.BlockSpec((1, H), lambda g: (0, 0)),
                pl.BlockSpec((H, O), lambda g: (0, 0)),
                pl.BlockSpec((1, O), lambda g: (0, 0)),
            ],
            out_specs=pl.BlockSpec((1, sup, O), lambda g: (g, 0, 0)),
            compiler_params=cparams,
        )(x, mflat, mnorm_g, avg_mat, seg_sum,
          params["ln_gamma"], params["ln_beta"],
          params["w_ctx"], params["b_ctx"],
          w1e, w1c, params["b1"], params["w2"], params["b2"])
        return out.reshape(B, O)

    # ---------------------------- no-context path ---------------------------
    H = params["w1"].shape[1]
    O = params["w2"].shape[1]
    x = summed.reshape(B * W, E)
    mflat = mnorm.reshape(B * W, 1)
    seg_sum = jnp.repeat(jnp.eye(B, dtype=jnp.float32), W, axis=1)    # (B, B*W)

    kernel = functools.partial(fused_nocontext_kernel, mm_dtype=matmul_dtype)
    out = pl.pallas_call(
        kernel,
        out_shape=jax.ShapeDtypeStruct((B, O), jnp.float32),
        grid=(1,),
        in_specs=[
            pl.BlockSpec((B * W, E), lambda i: (0, 0)),
            pl.BlockSpec((B * W, 1), lambda i: (0, 0)),
            pl.BlockSpec((B, B * W), lambda i: (0, 0)),
            pl.BlockSpec((1, E), lambda i: (0, 0)),
            pl.BlockSpec((1, E), lambda i: (0, 0)),
            pl.BlockSpec((E, H), lambda i: (0, 0)),
            pl.BlockSpec((1, H), lambda i: (0, 0)),
            pl.BlockSpec((H, O), lambda i: (0, 0)),
            pl.BlockSpec((1, O), lambda i: (0, 0)),
        ],
        out_specs=pl.BlockSpec((B, O), lambda i: (0, 0)),
        compiler_params=pltpu.CompilerParams(
            dimension_semantics=("arbitrary",),
            vmem_limit_bytes=32 * 1024 * 1024),
    )(x, mflat, seg_sum, params["ln_gamma"], params["ln_beta"],
      params["w1"], params["b1"], params["w2"], params["b2"])
    return out


# ------------------------------------------------------ pure-JAX reference ---

def reference_forward(sentence, attention_mask, params, support_size,
                      use_context=True):
    B, W = sentence.shape
    summed = (jnp.take(params["word_emb"], sentence, axis=0)
              + params["pos_emb"][None, :W, :]
              + params["tok_type_emb"][0][None, None, :])
    mu = summed.mean(-1, keepdims=True)
    var = ((summed - mu) ** 2).mean(-1, keepdims=True)
    embeds = ((summed - mu) / jnp.sqrt(var + LN_EPS)
              * params["ln_gamma"][0] + params["ln_beta"][0])
    if use_context:
        ctx = jnp.tanh(embeds @ params["w_ctx"] + params["b_ctx"][0])
        if B % support_size == 0:
            meta_B, sup = B // support_size, support_size
        else:
            meta_B, sup = 1, B
        ctx = ctx.reshape(meta_B, sup, W, -1).mean(axis=1)
        ctx = jnp.repeat(ctx, sup, axis=0)
        embeds = jnp.concatenate([embeds, ctx], axis=-1)
    m = attention_mask.astype(jnp.float32)
    pooled = (embeds * m[:, :, None]).sum(1) / jnp.maximum(
        m.sum(1, keepdims=True), 1.0)
    h = jnp.maximum(pooled @ params["w1"] + params["b1"][0], 0.0)
    return h @ params["w2"] + params["b2"][0]


# -------------------------------------------------------------------- main ---

if __name__ == "__main__":
    VOCAB = 64
    E = 32                 # embedding_dim
    W = 8                  # sequence length
    SUPPORT = 4            # support_size
    META_B = 2
    B = META_B * SUPPORT   # batch_size = 8 (divisible by support_size)
    CTX_H = 16             # context_hidden_dim
    PRED_H = 32            # pred_hidden_dim
    PRED_O = 8             # pred_output_dim

    key = jax.random.PRNGKey(0)
    ks = jax.random.split(key, 12)

    params = {
        "word_emb": 0.02 * jax.random.normal(ks[0], (VOCAB, E), jnp.float32),
        "pos_emb": 0.02 * jax.random.normal(ks[1], (W, E), jnp.float32),
        "tok_type_emb": 0.02 * jax.random.normal(ks[2], (2, E), jnp.float32),
        "ln_gamma": jnp.ones((1, E), jnp.float32),
        "ln_beta": jnp.zeros((1, E), jnp.float32),
        "w_ctx": 0.1 * jax.random.normal(ks[3], (E, CTX_H), jnp.float32),
        "b_ctx": jnp.zeros((1, CTX_H), jnp.float32),
        "w1": 0.1 * jax.random.normal(ks[4], (E + CTX_H, PRED_H), jnp.float32),
        "b1": jnp.zeros((1, PRED_H), jnp.float32),
        "w2": 0.1 * jax.random.normal(ks[5], (PRED_H, PRED_O), jnp.float32),
        "b2": jnp.zeros((1, PRED_O), jnp.float32),
    }

    sentence = jax.random.randint(ks[6], (B, W), 0, VOCAB, dtype=jnp.int32)
    attention_mask = jnp.ones((B, W), dtype=jnp.int32)
    raw_x = jax.random.normal(ks[7], (B, W), jnp.float32)

    # ---- context path (reference config: use_context=True) ----
    out = contextual_net_forward(
        sentence, attention_mask, raw_x, params,
        support_size=SUPPORT, use_context=True,
    )
    out = jax.block_until_ready(out)
    assert out.shape == (B, PRED_O) and out.dtype == jnp.float32
    ref = reference_forward(sentence, attention_mask, params,
                            support_size=SUPPORT, use_context=True)
    assert bool(jnp.allclose(out, ref, atol=1e-4, rtol=1e-3)), "context mismatch"

    # ---- no-context path (new_embed_dim = E) ----
    params_nc = dict(params,
                     w1=0.1 * jax.random.normal(ks[8], (E, PRED_H), jnp.float32))
    out_nc = contextual_net_forward(
        sentence, attention_mask, raw_x, params_nc,
        support_size=SUPPORT, use_context=False,
    )
    out_nc = jax.block_until_ready(out_nc)
    assert out_nc.shape == (B, PRED_O)
    ref_nc = reference_forward(sentence, attention_mask, params_nc,
                               support_size=SUPPORT, use_context=False)
    assert bool(jnp.allclose(out_nc, ref_nc, atol=1e-4, rtol=1e-3)), "no-ctx mismatch"

    print("KERNEL_OK")
</pallas_src>

<mosaic_0001>
module attributes {stable_mosaic.version = 11 : i64} {
  func.func @fused_context_kernel(%arg0: i32, %arg1: memref<1x32x32xf32, #tpu.memory_space<vmem>>, %arg2: memref<1x32x1xf32, #tpu.memory_space<vmem>>, %arg3: memref<1x4x8xf32, #tpu.memory_space<vmem>>, %arg4: memref<8x32xf32, #tpu.memory_space<vmem>>, %arg5: memref<4x32xf32, #tpu.memory_space<vmem>>, %arg6: memref<1x32xf32, #tpu.memory_space<vmem>>, %arg7: memref<1x32xf32, #tpu.memory_space<vmem>>, %arg8: memref<32x16xf32, #tpu.memory_space<vmem>>, %arg9: memref<1x16xf32, #tpu.memory_space<vmem>>, %arg10: memref<32x32xf32, #tpu.memory_space<vmem>>, %arg11: memref<16x32xf32, #tpu.memory_space<vmem>>, %arg12: memref<1x32xf32, #tpu.memory_space<vmem>>, %arg13: memref<32x8xf32, #tpu.memory_space<vmem>>, %arg14: memref<1x8xf32, #tpu.memory_space<vmem>>, %arg15: memref<1x4x8xf32, #tpu.memory_space<vmem>>) attributes {dimension_semantics = [#tpu.dimension_semantics<parallel>], iteration_bounds = array<i64: 2>, scalar_prefetch = 0 : i64, scratch_operands = 0 : i64, tpu.core_type = #tpu.core_type<tc>, window_params = [{transform_indices = @transform_0, window_bounds = array<i64: 1, 32, 32>}, {transform_indices = @transform_1, window_bounds = array<i64: 1, 32, 1>}, {transform_indices = @transform_2, window_bounds = array<i64: 1, 4, 8>}, {pipeline_mode = #tpu.pipeline_mode<synchronous>, transform_indices = @transform_3, window_bounds = array<i64: 8, 32>}, {pipeline_mode = #tpu.pipeline_mode<synchronous>, transform_indices = @transform_4, window_bounds = array<i64: 4, 32>}, {pipeline_mode = #tpu.pipeline_mode<synchronous>, transform_indices = @transform_5, window_bounds = array<i64: 1, 32>}, {pipeline_mode = #tpu.pipeline_mode<synchronous>, transform_indices = @transform_6, window_bounds = array<i64: 1, 32>}, {pipeline_mode = #tpu.pipeline_mode<synchronous>, transform_indices = @transform_7, window_bounds = array<i64: 32, 16>}, {pipeline_mode = #tpu.pipeline_mode<synchronous>, transform_indices = @transform_8, window_bounds = array<i64: 1, 16>}, {pipeline_mode = #tpu.pipeline_mode<synchronous>, transform_indices = @transform_9, window_bounds = array<i64: 32, 32>}, {pipeline_mode = #tpu.pipeline_mode<synchronous>, transform_indices = @transform_10, window_bounds = array<i64: 16, 32>}, {pipeline_mode = #tpu.pipeline_mode<synchronous>, transform_indices = @transform_11, window_bounds = array<i64: 1, 32>}, {pipeline_mode = #tpu.pipeline_mode<synchronous>, transform_indices = @transform_12, window_bounds = array<i64: 32, 8>}, {pipeline_mode = #tpu.pipeline_mode<synchronous>, transform_indices = @transform_13, window_bounds = array<i64: 1, 8>}, {transform_indices = @transform_14, window_bounds = array<i64: 1, 4, 8>}]} {
    %c0 = arith.constant 0 : index
    %c0_0 = arith.constant 0 : index
    %c0_1 = arith.constant 0 : index
    %0 = vector.load %arg1[%c0, %c0_0, %c0_1] : memref<1x32x32xf32, #tpu.memory_space<vmem>>, vector<1x32x32xf32>
    %1 = vector.shape_cast %0 : vector<1x32x32xf32> to vector<32x32xf32>
    %cst = arith.constant dense<0.000000e+00> : vector<32xf32>
    %2 = vector.multi_reduction <add>, %1, %cst [1] : vector<32x32xf32> to vector<32xf32>
    %3 = vector.shape_cast %2 : vector<32xf32> to vector<32x1xf32>
    %cst_2 = arith.constant 3.200000e+01 : f32
    %4 = vector.broadcast %cst_2 : f32 to vector<32x1xf32>
    %5 = arith.divf %3, %4 : vector<32x1xf32>
    %6 = vector.broadcast %5 : vector<32x1xf32> to vector<32x32xf32>
    %7 = arith.subf %1, %6 : vector<32x32xf32>
    %8 = arith.mulf %7, %7 : vector<32x32xf32>
    %cst_3 = arith.constant dense<0.000000e+00> : vector<32xf32>
    %9 = vector.multi_reduction <add>, %8, %cst_3 [1] : vector<32x32xf32> to vector<32xf32>
    %10 = vector.shape_cast %9 : vector<32xf32> to vector<32x1xf32>
    %cst_4 = arith.constant 3.200000e+01 : f32
    %11 = vector.broadcast %cst_4 : f32 to vector<32x1xf32>
    %12 = arith.divf %10, %11 : vector<32x1xf32>
    %13 = vector.broadcast %5 : vector<32x1xf32> to vector<32x32xf32>
    %14 = arith.subf %1, %13 : vector<32x32xf32>
    %cst_5 = arith.constant 9.99999996E-13 : f32
    %15 = vector.broadcast %cst_5 : f32 to vector<32x1xf32>
    %16 = arith.addf %12, %15 : vector<32x1xf32>
    %17 = math.rsqrt %16 : vector<32x1xf32>
    %18 = vector.broadcast %17 : vector<32x1xf32> to vector<32x32xf32>
    %19 = arith.mulf %14, %18 : vector<32x32xf32>
    %c0_6 = arith.constant 0 : index
    %c0_7 = arith.constant 0 : index
    %20 = vector.load %arg6[%c0_6, %c0_7] : memref<1x32xf32, #tpu.memory_space<vmem>>, vector<1x32xf32>
    %21 = vector.broadcast %20 : vector<1x32xf32> to vector<32x32xf32>
    %22 = arith.mulf %19, %21 : vector<32x32xf32>
    %c0_8 = arith.constant 0 : index
    %c0_9 = arith.constant 0 : index
    %23 = vector.load %arg7[%c0_8, %c0_9] : memref<1x32xf32, #tpu.memory_space<vmem>>, vector<1x32xf32>
    %24 = vector.broadcast %23 : vector<1x32xf32> to vector<32x32xf32>
    %25 = arith.addf %22, %24 : vector<32x32xf32>
    %c0_10 = arith.constant 0 : index
    %c0_11 = arith.constant 0 : index
    %26 = vector.load %arg8[%c0_10, %c0_11] : memref<32x16xf32, #tpu.memory_space<vmem>>, vector<32x16xf32>
    %cst_12 = arith.constant dense<0.000000e+00> : vector<32x16xf32>
    %27 = tpu.matmul %25, %26, %cst_12 {dimension_numbers = #tpu.dot_dimension_numbers<[1], [0], [0], [1], [0, 0, 1, 1], [], []>} : vector<32x32xf32>, vector<32x16xf32>, vector<32x16xf32> -> vector<32x16xf32>
    %c0_13 = arith.constant 0 : index
    %c0_14 = arith.constant 0 : index
    %28 = vector.load %arg9[%c0_13, %c0_14] : memref<1x16xf32, #tpu.memory_space<vmem>>, vector<1x16xf32>
    %29 = vector.broadcast %28 : vector<1x16xf32> to vector<32x16xf32>
    %30 = arith.addf %27, %29 : vector<32x16xf32>
    %31 = math.tanh %30 : vector<32x16xf32>
    %c0_15 = arith.constant 0 : index
    %c0_16 = arith.constant 0 : index
    %32 = vector.load %arg4[%c0_15, %c0_16] : memref<8x32xf32, #tpu.memory_space<vmem>>, vector<8x32xf32>
    %cst_17 = arith.constant dense<0.000000e+00> : vector<8x16xf32>
    %33 = tpu.matmul %32, %31, %cst_17 {dimension_numbers = #tpu.dot_dimension_numbers<[1], [0], [0], [1], [0, 0, 1, 1], [], []>} : vector<8x32xf32>, vector<32x16xf32>, vector<8x16xf32> -> vector<8x16xf32>
    %c0_18 = arith.constant 0 : index
    %c0_19 = arith.constant 0 : index
    %34 = vector.load %arg5[%c0_18, %c0_19] : memref<4x32xf32, #tpu.memory_space<vmem>>, vector<4x32xf32>
    %c0_20 = arith.constant 0 : index
    %c0_21 = arith.constant 0 : index
    %c0_22 = arith.constant 0 : index
    %35 = vector.load %arg2[%c0_20, %c0_21, %c0_22] : memref<1x32x1xf32, #tpu.memory_space<vmem>>, vector<1x32x1xf32>
    %36 = vector.shape_cast %35 : vector<1x32x1xf32> to vector<32x1xf32>
    %37 = vector.broadcast %36 : vector<32x1xf32> to vector<32x32xf32>
    %38 = arith.mulf %25, %37 : vector<32x32xf32>
    %cst_23 = arith.constant dense<0.000000e+00> : vector<4x32xf32>
    %39 = tpu.matmul %34, %38, %cst_23 {dimension_numbers = #tpu.dot_dimension_numbers<[1], [0], [0], [1], [0, 0, 1, 1], [], []>} : vector<4x32xf32>, vector<32x32xf32>, vector<4x32xf32> -> vector<4x32xf32>
    %c0_24 = arith.constant 0 : index
    %c0_25 = arith.constant 0 : index
    %c0_26 = arith.constant 0 : index
    %40 = vector.load %arg3[%c0_24, %c0_25, %c0_26] : memref<1x4x8xf32, #tpu.memory_space<vmem>>, vector<1x4x8xf32>
    %41 = vector.shape_cast %40 : vector<1x4x8xf32> to vector<4x8xf32>
    %cst_27 = arith.constant dense<0.000000e+00> : vector<4x16xf32>
    %42 = tpu.matmul %41, %33, %cst_27 {dimension_numbers = #tpu.dot_dimension_numbers<[1], [0], [0], [1], [0, 0, 1, 1], [], []>} : vector<4x8xf32>, vector<8x16xf32>, vector<4x16xf32> -> vector<4x16xf32>
    %c0_28 = arith.constant 0 : index
    %c0_29 = arith.constant 0 : index
    %43 = vector.load %arg10[%c0_28, %c0_29] : memref<32x32xf32, #tpu.memory_space<vmem>>, vector<32x32xf32>
    %cst_30 = arith.constant dense<0.000000e+00> : vector<4x32xf32>
    %44 = tpu.matmul %39, %43, %cst_30 {dimension_numbers = #tpu.dot_dimension_numbers<[1], [0], [0], [1], [0, 0, 1, 1], [], []>} : vector<4x32xf32>, vector<32x32xf32>, vector<4x32xf32> -> vector<4x32xf32>
    %c0_31 = arith.constant 0 : index
    %c0_32 = arith.constant 0 : index
    %45 = vector.load %arg11[%c0_31, %c0_32] : memref<16x32xf32, #tpu.memory_space<vmem>>, vector<16x32xf32>
    %cst_33 = arith.constant dense<0.000000e+00> : vector<4x32xf32>
    %46 = tpu.matmul %42, %45, %cst_33 {dimension_numbers = #tpu.dot_dimension_numbers<[1], [0], [0], [1], [0, 0, 1, 1], [], []>} : vector<4x16xf32>, vector<16x32xf32>, vector<4x32xf32> -> vector<4x32xf32>
    %47 = arith.addf %44, %46 : vector<4x32xf32>
    %c0_34 = arith.constant 0 : index
    %c0_35 = arith.constant 0 : index
    %48 = vector.load %arg12[%c0_34, %c0_35] : memref<1x32xf32, #tpu.memory_space<vmem>>, vector<1x32xf32>
    %49 = vector.broadcast %48 : vector<1x32xf32> to vector<4x32xf32>
    %50 = arith.addf %47, %49 : vector<4x32xf32>
    %cst_36 = arith.constant 0.000000e+00 : f32
    %51 = vector.broadcast %cst_36 : f32 to vector<4x32xf32>
    %52 = arith.maximumf %50, %51 : vector<4x32xf32>
    %c0_37 = arith.constant 0 : index
    %c0_38 = arith.constant 0 : index
    %53 = vector.load %arg13[%c0_37, %c0_38] : memref<32x8xf32, #tpu.memory_space<vmem>>, vector<32x8xf32>
    %cst_39 = arith.constant dense<0.000000e+00> : vector<4x8xf32>
    %54 = tpu.matmul %52, %53, %cst_39 {dimension_numbers = #tpu.dot_dimension_numbers<[1], [0], [0], [1], [0, 0, 1, 1], [], []>} : vector<4x32xf32>, vector<32x8xf32>, vector<4x8xf32> -> vector<4x8xf32>
    %c0_40 = arith.constant 0 : index
    %c0_41 = arith.constant 0 : index
    %55 = vector.load %arg14[%c0_40, %c0_41] : memref<1x8xf32, #tpu.memory_space<vmem>>, vector<1x8xf32>
    %56 = vector.broadcast %55 : vector<1x8xf32> to vector<4x8xf32>
    %57 = arith.addf %54, %56 : vector<4x8xf32>
    %c0_42 = arith.constant 0 : index
    %c0_43 = arith.constant 0 : index
    %c0_44 = arith.constant 0 : index
    %58 = vector.load %arg15[%c0_42, %c0_43, %c0_44] : memref<1x4x8xf32, #tpu.memory_space<vmem>>, vector<1x4x8xf32>
    %59 = vector.shape_cast %58 : vector<1x4x8xf32> to vector<4x8xf32>
    %60 = vector.shape_cast %57 : vector<4x8xf32> to vector<1x4x8xf32>
    tpu.vector_store %arg15[%c0_42, %c0_43, %c0_44], %60 {strides = array<i32>} : memref<1x4x8xf32, #tpu.memory_space<vmem>>, vector<1x4x8xf32>,
    return
  }
  func.func @transform_0(%arg0: i32) -> (i32, i32, i32) {
    %c0_i32 = arith.constant 0 : i32
    %c0_i32_0 = arith.constant 0 : i32
    %c0_i32_1 = arith.constant 0 : i32
    return %arg0, %c0_i32, %c0_i32_0 : i32, i32, i32
  }
  func.func @transform_1(%arg0: i32) -> (i32, i32, i32) {
    %c0_i32 = arith.constant 0 : i32
    %c0_i32_0 = arith.constant 0 : i32
    %c0_i32_1 = arith.constant 0 : i32
    return %arg0, %c0_i32, %c0_i32_0 : i32, i32, i32
  }
  func.func @transform_2(%arg0: i32) -> (i32, i32, i32) {
    %c0_i32 = arith.constant 0 : i32
    %c0_i32_0 = arith.constant 0 : i32
    %c0_i32_1 = arith.constant 0 : i32
    return %arg0, %c0_i32, %c0_i32_0 : i32, i32, i32
  }
  func.func @transform_3(%arg0: i32) -> (i32, i32) {
    %c0_i32 = arith.constant 0 : i32
    %c0_i32_0 = arith.constant 0 : i32
    %c0_i32_1 = arith.constant 0 : i32
    return %c0_i32, %c0_i32_0 : i32, i32
  }
  func.func @transform_4(%arg0: i32) -> (i32, i32) {
    %c0_i32 = arith.constant 0 : i32
    %c0_i32_0 = arith.constant 0 : i32
    %c0_i32_1 = arith.constant 0 : i32
    return %c0_i32, %c0_i32_0 : i32, i32
  }
  func.func @transform_5(%arg0: i32) -> (i32, i32) {
    %c0_i32 = arith.constant 0 : i32
    %c0_i32_0 = arith.constant 0 : i32
    %c0_i32_1 = arith.constant 0 : i32
    return %c0_i32, %c0_i32_0 : i32, i32
  }
  func.func @transform_6(%arg0: i32) -> (i32, i32) {
    %c0_i32 = arith.constant 0 : i32
    %c0_i32_0 = arith.constant 0 : i32
    %c0_i32_1 = arith.constant 0 : i32
    return %c0_i32, %c0_i32_0 : i32, i32
  }
  func.func @transform_7(%arg0: i32) -> (i32, i32) {
    %c0_i32 = arith.constant 0 : i32
    %c0_i32_0 = arith.constant 0 : i32
    %c0_i32_1 = arith.constant 0 : i32
    return %c0_i32, %c0_i32_0 : i32, i32
  }
  func.func @transform_8(%arg0: i32) -> (i32, i32) {
    %c0_i32 = arith.constant 0 : i32
    %c0_i32_0 = arith.constant 0 : i32
    %c0_i32_1 = arith.constant 0 : i32
    return %c0_i32, %c0_i32_0 : i32, i32
  }
  func.func @transform_9(%arg0: i32) -> (i32, i32) {
    %c0_i32 = arith.constant 0 : i32
    %c0_i32_0 = arith.constant 0 : i32
    %c0_i32_1 = arith.constant 0 : i32
    return %c0_i32, %c0_i32_0 : i32, i32
  }
  func.func @transform_10(%arg0: i32) -> (i32, i32) {
    %c0_i32 = arith.constant 0 : i32
    %c0_i32_0 = arith.constant 0 : i32
    %c0_i32_1 = arith.constant 0 : i32
    return %c0_i32, %c0_i32_0 : i32, i32
  }
  func.func @transform_11(%arg0: i32) -> (i32, i32) {
    %c0_i32 = arith.constant 0 : i32
    %c0_i32_0 = arith.constant 0 : i32
    %c0_i32_1 = arith.constant 0 : i32
    return %c0_i32, %c0_i32_0 : i32, i32
  }
  func.func @transform_12(%arg0: i32) -> (i32, i32) {
    %c0_i32 = arith.constant 0 : i32
    %c0_i32_0 = arith.constant 0 : i32
    %c0_i32_1 = arith.constant 0 : i32
    return %c0_i32, %c0_i32_0 : i32, i32
  }
  func.func @transform_13(%arg0: i32) -> (i32, i32) {
    %c0_i32 = arith.constant 0 : i32
    %c0_i32_0 = arith.constant 0 : i32
    %c0_i32_1 = arith.constant 0 : i32
    return %c0_i32, %c0_i32_0 : i32, i32
  }
  func.func @transform_14(%arg0: i32) -> (i32, i32, i32) {
    %c0_i32 = arith.constant 0 : i32
    %c0_i32_0 = arith.constant 0 : i32
    %c0_i32_1 = arith.constant 0 : i32
    return %arg0, %c0_i32, %c0_i32_0 : i32, i32, i32
  }
}

</mosaic_0001>

<bundles_post_ra>
// kernel: tpu_custom_call.1
= control target key start
LH: loop header
LB: loop body
LE: loop exit
PB: predicated region body
PF: predicated region fallthrough
CT: control target
= control target key end

     0   :  { %s1890_s0 = inlined_call_operand.vmem [shape: f32[2,32,32], index: 0, kind: input, shape index: {}]   ;;  %s1891_s1 = inlined_call_operand.vmem [shape: f32[2,32,1], index: 1, kind: input, shape index: {}]   ;;  %s1892_s2 = inlined_call_operand.vmem [shape: f32[2,4,8], index: 2, kind: input, shape index: {}]   ;;  %s1893_s3 = inlined_call_operand.vmem [shape: f32[8,32], index: 3, kind: input, shape index: {}]   ;;  %s1894_s4 = inlined_call_operand.vmem [shape: f32[4,32], index: 4, kind: input, shape index: {}]   ;;  %s1895_s5 = inlined_call_operand.vmem [shape: f32[1,32], index: 5, kind: input, shape index: {}]   ;;  %s1896_s6 = inlined_call_operand.vmem [shape: f32[1,32], index: 6, kind: input, shape index: {}]   ;;  %s1897_s7 = inlined_call_operand.vmem [shape: f32[32,16], index: 7, kind: input, shape index: {}]   ;;  %s1898_s8 = inlined_call_operand.vmem [shape: f32[1,16], index: 8, kind: input, shape index: {}]   ;;  %s1899_s9 = inlined_call_operand.vmem [shape: f32[32,32], index: 9, kind: input, shape index: {}]   ;;  %s1900_s10 = inlined_call_operand.vmem [shape: f32[16,32], index: 10, kind: input, shape index: {}]   ;;  %s1901_s11 = inlined_call_operand.vmem [shape: f32[1,32], index: 11, kind: input, shape index: {}]   ;;  %s1902_s12 = inlined_call_operand.vmem [shape: f32[32,8], index: 12, kind: input, shape index: {}]   ;;  %s1903_s13 = inlined_call_operand.vmem [shape: f32[1,8], index: 13, kind: input, shape index: {}]   ;;  %s1904_s14 = inlined_call_operand.hbm [shape: f32[2,4,8], index: 14, kind: output, shape index: {}]  }
   0x1   :  { %1905 = sst [smem:[#allocation6_spill]] %s1890_s0 }
   0x2   :  { %1906 = sst [smem:[#allocation7_spill]] %s1891_s1 }
   0x3   :  { %1907 = sst [smem:[#allocation8_spill]] %s1893_s3 }
   0x4   :  { %19 = vsyncpa [#allocation3], 0 }
   0x5   :  { %21 = vsyncpa [#allocation3 + $0x1], 0  ;;  %s1665_s29 = smov 0   ;;  %s1667_s30 = smov 0  }
   0x6   :  { %s1669_s15 = smov 0   ;;  %s1671_s16 = smov 0  }
   0x7 LB: > { %s1686_s17 = sadd.s32 4294967295, %s1583_s16   ;;  %s1291_s18 = sadd.s32 4294967294, %s1583_s16   ;;  %s1583_s16 = sphi %s1671_s16, %s1918_s16   ;;  %s1579_s15 = sphi %s1669_s15, %s1917_s15   ;;  %s1575_s30 = sphi %s1667_s30, %s1916_s30   ;;  %s1571_s29 = sphi %s1665_s29, %s1915_s29  }
   0x8   : > { %s1690_s19 = sadd.s32 1, %s1583_s16   ;;  %s343_s20 = sadd.s32 1, %s1579_s15 }
   0x9   : > { %s340_s21 = ssub.s32 %s1583_s16, %s1690_s19  ;;  %p353_p0 = scmp.ne.s32.totalorder %s1579_s15, %s1575_s30 }
   0xa   : > { %p341_p1 = scmp.eq.s32.totalorder %s340_s21, 0  ;;  %p354_p2 = scmp.eq.s32.totalorder %s1686_s17, 1 }
   0xb   : > { %p359_p3 = scmp.ne.s32.totalorder %s1575_s30, %s1571_s29  ;;  %p360_p4 = scmp.eq.s32.totalorder %s1291_s18, 1 }
   0xc   : > { %s1701_s22 = scalar_select %p341_p1, %s1579_s15, %s343_s20  }
   0xd   : > { %p1703_p5 = por %p354_p2, %p353_p0  ;;  %p1707_p6 = por %p360_p4, %p359_p3 }
   0xe   : > { %1908 = sst [smem:[#allocation5_spill]] %s1701_s22  ;;  %p1294_p7 = scmp.ge.s32.totalorder %s1583_s16, 1 }
   0xf   : > { %p434_p8 = scmp.lt.s32.totalorder %s1583_s16, 3 }
  0x11   : > { %p435_p9 = pnand %p1294_p7, %p434_p8 }
  0x12   : > { %p489_p10 = scmp.lt.s32.totalorder (!%p435_p9), %s1686_s17, 1  ;;  %vm507_vm0 = vcmask (!%p435_p9), 261120   ;;  %s1911_s0 = sld [smem:[#allocation6_spill]] (!%p435_p9)  ;;  %v1585_v8 = vmov (!%p435_p9), 0   ;;  %v583_v32 = vld [vmem:[%s1897_s7] sm:$0xff] (!%p435_p9)  ;;  %v584_v33 = vld [vmem:[%s1897_s7 + $0x8] sm:$0xff] (!%p435_p9) }
  0x13   : > { %438 = sbr.rel (%p435_p9) target bundleno = 1454 (0x5ae), region = 76  ;;  %1504 = vset.pattern.permute.xlu1 (!%p435_p9), %v1585_v8  ;;  %1503 = vset.pattern.permute.xlu0 (!%p435_p9), %v1585_v8  ;;  %s1912_s1 = sld [smem:[#allocation7_spill]] (!%p435_p9)  ;;  %v1425_v34 = vpack.c.bf16 (!%p435_p9), %v584_v33, %v583_v32  ;;  %v585_v36 = vld [vmem:[%s1897_s7 + $0x10] sm:$0xff] (!%p435_p9)  ;;  %v586_v37 = vld [vmem:[%s1897_s7 + $0x18] sm:$0xff] (!%p435_p9)  ;;  %v1586_v39 = vmov (!%p435_p9), 0.0|0.0   ;;  %vm1587_vm1 = vmmov (!%p435_p9), 0  }
  0x14   : > { %v1429_v38 = vpack.c.bf16 (!%p435_p9), %v586_v37, %v585_v36  ;;  %1433 = vmatprep.subr.bf16.mxu1 (!%p435_p9), %v1586_v39  ;;  %v1301_v53 = vld [vmem:[%s1895_s5] ss:$0 sm:$0xff] (!%p435_p9)  ;;  %s1913_s3 = sld [smem:[#allocation8_spill]] (!%p435_p9)  ;;  %v948_v37 = vld [vmem:[%s1899_s9 + $0x10] sm:$0xff] (!%p435_p9)  ;;  %vm872_vm2 = vcmask (!%p435_p9), 64512   ;;  %vm952_vm3 = vcmask (!%p435_p9), 130048  }
  0x15   : > { %1426 = vmatprep.subr.bf16.mxu0 (!%p435_p9), %v1425_v34  ;;  %v1302_v56 = vld [vmem:[%s1896_s6] ss:$0 sm:$0xff] (!%p435_p9)  ;;  %s1317_s21 = sshll.u32 (!%p435_p9), %s1686_s17, 6  ;;  %vm1192_vm4 = vcmask (!%p435_p9), 60416  }
  0x16   : > { %1428 = vmatpush3.bf16.msra.mxu0 (!%p435_p9), %v1425_v34  ;;  %v769_v33 = vld [vmem:[%s1894_s4] sm:$0xf] (!%p435_p9)  ;;  %s1848_s28 = scalar_lea.hbm (!%p435_p9), %s1904_s14, %s1317_s21 }
  0x17   : > { %1430 = vmatprep.subr.bf16.mxu0 (!%p435_p9), %v1429_v38  ;;  %v946_v34 = vld [vmem:[%s1899_s9] sm:$0xff] (!%p435_p9) }
  0x1a   : > { %s1715_s25 = scalar_select %p489_p10, %s1686_s17, 1  ;;  %1432 = vmatpush3.bf16.msra.mxu0 %v1429_v38  ;;  %v695_v32 = vld [vmem:[%s1913_s3] sm:$0xff]  ;;  %v949_v38 = vld [vmem:[%s1899_s9 + $0x18] sm:$0xff] }
  0x1b   : > { %1439 = vmatprep.subr.bf16.mxu0 %v1586_v39  ;;  %s1589_s17 = smov [#allocation2]  }
  0x1c   : > { %s1320_s26 = sshll.u32 %s1715_s25, 5 }
  0x1d   : > { %s493_s18 = scalar_lea.vmem %s1911_s0, %s1320_s26  ;;  %s498_s27 = scalar_lea.vmem %s1912_s1, %s1320_s26 }
  0x1e   : > { %v503_v0 = vld [vmem:[%s493_s18] sm:$0xff]  ;;  %v505_v1 = vld [vmem:[%s493_s18 + $0x10] sm:$0xff]  ;;  %v504_v2 = vld [vmem:[%s493_s18 + $0x8] sm:$0xff]  ;;  %s1300_s0 = sshll.u32 %s1715_s25, 2  ;;  %s486_s26 = sand.u32 1, %s1575_s30  }
  0x1f   : > { %v508_v3 = vsel %vm507_vm0, %v503_v0, 0.0  ;;  %v514_v4 = vsel %vm507_vm0, %v505_v1, 0.0  ;;  %v506_v5 = vld [vmem:[%s493_s18 + $0x18] sm:$0xff]  ;;  %v511_v6 = vsel %vm507_vm0, %v504_v2, 0.0  ;;  %v771_v29 = vld [vmem:[%s498_s27 + $0x8] sm:$0xff]  ;;  %v770_v30 = vld [vmem:[%s498_s27] sm:$0xff] }
  0x20   : > { %509 = vadd.xlane.f32.xlu0 %v508_v3  ;;  %515 = vadd.xlane.f32.xlu1 %v514_v4  ;;  %v517_v7 = vsel %vm507_vm0, %v506_v5, 0.0  ;;  %v772_v31 = vld [vmem:[%s498_s27 + $0x10] sm:$0xff]  ;;  %v773_v35 = vld [vmem:[%s498_s27 + $0x18] sm:$0xff]  ;;  %s502_s27 = scalar_lea.vmem %s1892_s2, %s1300_s0  ;;  %s1295_s3 = sshll.u32 %s486_s26, 2 }
  0x21   : > { %s488_s0 = scalar_lea.vmem [#allocation2], %s1295_s3  ;;  %s1195_s18 = scalar_lea.sflag [#allocation3], %s486_s26 }
  0x22   : > { %s1208_s1 = sshll.u32 %s488_s0, 4  ;;  %s1525_s3 = sshll.u32 %s1589_s17, 4  ;;  %s1850_s1 = int_to_ptr.vmem [resolvable:$true] %s1208_s1  ;;  %s1526_s3 = int_to_ptr.vmem [resolvable:$false] %s1525_s3 }
  0x23   : > { %s1521_s25 = scalar_lea.vmem %s1850_s1, 64  ;;  %s1527_s20 = scalar_lea.vmem %s1526_s3, 128 }
  0x24   : > { %512 = vadd.xlane.f32.xlu0 %v511_v6  ;;  %518 = vadd.xlane.f32.xlu1 %v517_v7  ;;  %p1522_p11 = scmp.ne.s32.totalorder %s1850_s1, %s1521_s25  ;;  %p1528_p0 = scmp.lt.s32.totalorder %s1850_s1, %s1526_s3 }
  0x25   : > { %p1529_p1 = scmp.lt.s32.totalorder %s1527_s20, %s1521_s25 }
  0x26   : > { %p1523_p12 = pnand %p1522_p11, %p1703_p5 }
  0x27   : > { %p1530_p2 = por %p1529_p1, %p1528_p0 }
  0x28   : > { %p1524_p13 = pneg %p1523_p12 }
  0x2a   : > { %p1531_p3 = pnand %p1530_p2, %p1524_p13 }
  0xad   : > { %v510_v9 = vpop.xlane.xlu0 %509  ;;  %v516_v10 = vpop.xlane.xlu1 %515 }
  0xae   : > { %v521_v11 = vmul.f32 0.03125, %v510_v9  ;;  %v523_v12 = vmul.f32 0.03125, %v516_v10 }
  0xb0   : > { %v525_v13 = vsub.f32 %v503_v0, %v521_v11  ;;  %v1727_v14 = vsub.f32 %v505_v1, %v523_v12 }
  0xb1   : > { %v513_v15 = vpop.xlane.xlu0 %512  ;;  %v519_v16 = vpop.xlane.xlu1 %518 }
  0xb2   : > { %v522_v17 = vmul.f32 0.03125, %v513_v15  ;;  %v524_v18 = vmul.f32 0.03125, %v519_v16  ;;  %v529_v19 = vmul.f32 %v525_v13, %v525_v13  ;;  %v531_v20 = vmul.f32 %v1727_v14, %v1727_v14 }
  0xb3   : > { %v1588_v16 = vmov 0.0  }
  0xb4   : > { %v526_v21 = vsub.f32 %v504_v2, %v522_v17  ;;  %v1731_v22 = vsub.f32 %v506_v5, %v524_v18  ;;  %v533_v23 = vsel %vm507_vm0, %v529_v19, 0.0  ;;  %v539_v24 = vsel %vm507_vm0, %v531_v20, 0.0  ;;  %1377 = vmatprep.mubr.msk.f32.mxu1 %vm1587_vm1, %v1588_v16  ;;  %v1303_v17 = vld [vmem:[%s1898_s8] ss:$0 sm:$0xff] }
  0xb5   : > { %534 = vadd.xlane.f32.xlu0 %v533_v23 }
  0xb6   : > { %v530_v25 = vmul.f32 %v526_v21, %v526_v21  ;;  %v532_v26 = vmul.f32 %v1731_v22, %v1731_v22 }
  0xb8   : > { %v536_v27 = vsel %vm507_vm0, %v530_v25, 0.0  ;;  %v542_v28 = vsel %vm507_vm0, %v532_v26, 0.0 }
  0xb9   : > { %540 = vadd.xlane.f32.xlu0 %v539_v24  ;;  %537 = vadd.xlane.f32.xlu1 %v536_v27 }
  0xbd   : > { %543 = vadd.xlane.f32.xlu1 %v542_v28 }
  0xce   : > { %781 = vperm.xlu1 %1504, %v771_v29  }
  0xcf   : > { %776 = vperm.xlu0 %1503, %v770_v30  }
  0xd2   : > { %786 = vperm.xlu1 %1504, %v772_v31  }
  0xd6   : > { %791 = vperm.xlu1 %1504, %v773_v35   ;;  %v947_v35 = vld [vmem:[%s1899_s9 + $0x8] sm:$0xff] }
  0xd7   : > { %v1449_v36 = vpack.c.bf16 %v947_v35, %v946_v34 }
 0x142   : > { %v535_v40 = vpop.xlane.xlu0 %534 }
 0x143   : > { %v545_v41 = vmul.f32 0.03125, %v535_v40  ;;  %v1452_v40 = vpack.c.bf16 %v949_v38, %v948_v37 }
 0x145   : > { %v549_v42 = vadd.f32 1e-12, %v545_v41  ;;  %v950_v41 = vld [vmem:[%s1900_s10] sm:$0xff] }
 0x146   : > { %v538_v43 = vpop.xlane.xlu1 %537  ;;  %v541_v44 = vpop.xlane.xlu0 %540 }
 0x147   : > { %1505 = vrsqrt.f32 %v549_v42  ;;  %v546_v45 = vmul.f32 0.03125, %v538_v43  ;;  %v547_v46 = vmul.f32 0.03125, %v541_v44  ;;  %v951_v42 = vld [vmem:[%s1900_s10 + $0x8] sm:$0xff]  ;;  %v871_v43 = vld [vmem:[%s502_s27] sm:$0xf] }
 0x148   : > { %v1446_v44 = vpack.c.bf16 %v951_v42, %v950_v41 }
 0x149   : > { %v550_v47 = vadd.f32 1e-12, %v546_v45  ;;  %v551_v48 = vadd.f32 1e-12, %v547_v46 }
 0x14a   : > { %v544_v49 = vpop.xlane.xlu1 %543 }
 0x14b   : > { %1507 = vrsqrt.f32 %v550_v47  ;;  %v548_v50 = vmul.f32 0.03125, %v544_v49 }
 0x14c   : > { %1509 = vrsqrt.f32 %v551_v48 }
 0x14d   : > { %v552_v51 = vadd.f32 1e-12, %v548_v50 }
 0x14e   : > { %v782_v54 = vpop.permute.xlu1 %781  ;;  %v777_v2 = vpop.permute.xlu0 %776 }
 0x14f   : > { %1511 = vrsqrt.f32 %v552_v51  ;;  %v1108_v51 = vld [vmem:[%s1902_s12] sm:$0xff] }
 0x151   : > { %v1506_v52 = vpop.eup %1505 }
 0x152   : > { %v557_v55 = vmul.f32 %v1506_v52, %v525_v13  ;;  %v787_v62 = vpop.permute.xlu1 %786  ;;  %v1109_v52 = vld [vmem:[%s1902_s12 + $0x8] sm:$0xff] }
 0x154   : > { %v568_v57 = vmul.f32 %v1301_v53, %v557_v55 }
 0x155   : > { %v1508_v58 = vpop.eup %1507 }
 0x156   : > { %v1510_v59 = vpop.eup %1509  ;;  %v558_v60 = vmul.f32 %v1508_v58, %v526_v21  ;;  %v579_v61 = vadd.f32 %v1302_v56, %v568_v57  ;;  %v792_v10 = vpop.permute.xlu1 %791  ;;  %v1111_v57 = vld [vmem:[%s1902_s12 + $0x18] sm:$0xff] }
 0x157   : > { %v559_v63 = vmul.f32 %v1510_v59, %v1727_v14 }
 0x158   : > { %v569_v0 = vmul.f32 %v1301_v53, %v558_v60  ;;  %1363 = vmatprep.mubr.msk.f32.mxu0 %vm507_vm0, %v579_v61  ;;  %v794_v8 = vmul.f32 %v777_v2, %v579_v61  ;;  %v1313_v60 = vld [vmem:[%s1901_s11] ss:$0 sm:$0xff] }
 0x159   : > { %v1512_v1 = vpop.eup %1511  ;;  %v570_v3 = vmul.f32 %v1301_v53, %v559_v63 }
 0x15a   : > { %v580_v4 = vadd.f32 %v1302_v56, %v569_v0  ;;  %v560_v5 = vmul.f32 %v1512_v1, %v1731_v22 }
 0x15b   : > { %v581_v6 = vadd.f32 %v1302_v56, %v570_v3 }
 0x15c   : > { %v795_v7 = vmul.f32 %v782_v54, %v580_v4  ;;  %1364 = vmatmul.mubr.msk.f32.vlgmr.msra.gmra.mrb[0].mxu0 %vm507_vm0, %v580_v4  ;;  %v571_v9 = vmul.f32 %v1301_v53, %v560_v5  ;;  %v1455_v53 = vpack.c.bf16 %v1109_v52, %v1108_v51 }
 0x15d   : > { %1366 = vmatprep.mubr.msk.f32.mxu0 %vm507_vm0, %v581_v6  ;;  %v796_v13 = vmul.f32 %v787_v62, %v581_v6 }
 0x15e   : > { %v1440_v11 = vpack.c.bf16 %v795_v7, %v794_v8  ;;  %v582_v12 = vadd.f32 %v1302_v56, %v571_v9  ;;  %v1110_v56 = vld [vmem:[%s1902_s12 + $0x10] sm:$0xff] }
 0x15f   : > { %v1458_v58 = vpack.c.bf16 %v1111_v57, %v1110_v56 }
 0x160   : > { %v797_v14 = vmul.f32 %v792_v10, %v582_v12  ;;  %1367 = vmatmul.mubr.msk.f32.gmra.mrb[2].mxu0 %vm507_vm0, %v582_v12 }
 0x161   : > { %1441 = vmatpush3.bf16.msra.mxu0 %v1440_v11  ;;  %1388 = vmatprep.mubr.msk.f32.mxu0 %vm1587_vm1, %v1588_v16 }
 0x162   : > { %v1443_v15 = vpack.c.bf16 %v797_v14, %v796_v13  ;;  %1442 = vmatprep.subr.bf16.mxu0 %v1586_v39 }
 0x165   : > { %1444 = vmatpush3.bf16.msra.mxu0 %v1443_v15 }
 0x166   : > { %1448 = vmatprep.subr.bf16.mxu0 %v1586_v39 }
 0x168   : > { %1389 = vmatmul.mubr.msk.f32.vlgmr.msra.gmra.mrb[4].mxu0 %vm507_vm0, %v769_v33 }
 0x169   : > { %1411 = vmatprep.mubr.msk.f32.mxu0 %vm1587_vm1, %v1588_v16  ;;  %1450 = vmatpush3.bf16.msra.mxu0 %v1449_v36 }
 0x16a   : > { %1451 = vmatprep.subr.bf16.mxu0 %v1586_v39 }
 0x16d   : > { %1453 = vmatpush3.bf16.msra.mxu0 %v1452_v40 }
 0x22f   : > { %v1365_v18 = vpop.f32.mrb[0].mxu0 }
 0x230   : > { %v678_v19 = vadd.f32 %v1365_v18, %v1303_v17  ;;  %v672_v20 = vpop.f32.mrb[1].mxu0 }
 0x231   : > { %v673_v21 = vadd.f32 %v1303_v17, %v672_v20 }
 0x232   : > { %1513 = vtanh.f32 %v678_v19 }
 0x233   : > { %1515 = vtanh.f32 %v673_v21  ;;  %v1368_v22 = vpop.f32.mrb[2].mxu0 }
 0x234   : > { %v688_v23 = vadd.f32 %v1368_v22, %v1303_v17  ;;  %v682_v24 = vpop.f32.mrb[3].mxu0 }
 0x235   : > { %v683_v25 = vadd.f32 %v1303_v17, %v682_v24 }
 0x236   : > { %1517 = vtanh.f32 %v688_v23 }
 0x237   : > { %1519 = vtanh.f32 %v683_v25 }
 0x23b   : > { %v867_v47 = vpop.f32.mrb[4].mxu0 }
 0x23c   : > { %v1514_v26 = vpop.eup %1513  ;;  %v1390_v48 = vpop.f32.mrb[5].mxu0  ;;  %1412 = vmatmul.mubr.msk.f32.vlgmr.msra.gmra.mrb[6].mxu0 %vm507_vm0, %v867_v47 }
 0x23d   : > { %v1516_v27 = vpop.eup %1515 }
 0x23e   : > { %v1434_v28 = vpack.c.bf16 %v1514_v26, %v1516_v27 }
 0x240   : > { %v1518_v29 = vpop.eup %1517  ;;  %1435 = vmatpush3.bf16.msra.mxu1 %v1434_v28 }
 0x241   : > { %v1520_v30 = vpop.eup %1519  ;;  %1436 = vmatprep.subr.bf16.mxu1 %v1586_v39 }
 0x242   : > { %v1437_v31 = vpack.c.bf16 %v1518_v29, %v1520_v30 }
 0x244   : > { %1438 = vmatpush3.bf16.msra.mxu1 %v1437_v31 }
 0x245   : > { %1391 = vmatprep.subr.mxu1 %v1588_v16 }
 0x247   : > { %1378 = vmatmul.mubr.msk.f32.vlgmr.msra.gmra.mrb[0].mxu1 %vm507_vm0, %v695_v32 }
 0x248   : > { %1393 = vmatprep.mubr.msk.f32.mxu1 %vm1587_vm1, %v1588_v16 }
 0x30f   : > { %v1095_v54 = vpop.f32.mrb[6].mxu0 }
 0x310   : > { %v1413_v55 = vpop.f32.mrb[7].mxu0 }
 0x31a   : > { %v765_v45 = vpop.f32.mrb[0].mxu1 }
 0x31b   : > { %v1379_v46 = vpop.f32.mrb[1].mxu1  ;;  %1392 = vmatpush3.msra.mxu1 %v765_v45 }
 0x31c   : > { %1394 = vmatmul.mubr.msk.f32.vlgmr.msra.gmra.mrb[2].mxu1 %vm872_vm2, %v871_v43  ;;  %1445 = vmatprep.subr.bf16.mxu1 %v1586_v39 }
 0x31d   : > { %1447 = vmatpush3.bf16.msra.mxu1 %v1446_v44  ;;  %1400 = vmatprep.mubr.msk.f32.mxu1 %vm1587_vm1, %v1588_v16 }
 0x31e   : > { %1454 = vmatprep.subr.bf16.mxu1 %v1586_v39 }
 0x3ef   : > { %v942_v49 = vpop.f32.mrb[2].mxu1 }
 0x3f0   : > { %v1395_v50 = vpop.f32.mrb[3].mxu1  ;;  %1401 = vmatmul.mubr.msk.f32.vlgmr.msra.gmra.mrb[4].mxu1 %vm952_vm3, %v942_v49 }
 0x3f1   : > { %1422 = vmatprep.mubr.msk.f32.mxu1 %vm1587_vm1, %v1588_v16  ;;  %1456 = vmatpush3.bf16.msra.mxu1 %v1455_v53 }
 0x3f2   : > { %1457 = vmatprep.subr.bf16.mxu1 %v1586_v39  ;;  %v1314_v39 = vld [vmem:[%s1903_s13] ss:$0 sm:$0xff] }
 0x3f5   : > { %1459 = vmatpush3.bf16.msra.mxu1 %v1458_v58 }
 0x4c3   : > { %v1022_v59 = vpop.f32.mrb[4].mxu1 }
 0x4c4   : > { %v1096_v61 = vadd.f32 %v1095_v54, %v1022_v59  ;;  %v1402_v62 = vpop.f32.mrb[5].mxu1 }
 0x4c6   : > { %v1106_v63 = vadd.f32 %v1313_v60, %v1096_v61 }
 0x4c8   : > { %v1107_v0 = vmax.f32 %v1106_v63, 0.0 }
 0x4ca   : > { %1423 = vmatmul.mubr.msk.f32.vlgmr.msra.gmra.mrb[6].mxu1 %vm507_vm0, %v1107_v0 }
 0x59d   : > { %v1188_v1 = vpop.f32.mrb[6].mxu1 }
 0x59e   : > { %v1189_v2 = vadd.f32 %v1314_v39, %v1188_v1  ;;  %v1424_v3 = vpop.f32.mrb[7].mxu1 }
 0x5a0   : > { %1193 = vst.msk [vmem:[%s488_s0] sm:$0xf] %vm1192_vm4, %v1189_v2 }
 0x5a1   : > { %1534 = shalt.err (!%p1531_p3)
}
 0x5a2   : > { %s1535_s26 = scalar_lea.hbm %s1848_s28, 64  ;;  %s1539_s22 = scalar_lea.hbm %s1904_s14, 128 }
 0x5a3   : > { %p1536_p4 = scmp.ne.s32.totalorder %s1848_s28, %s1535_s26  ;;  %p1540_p9 = scmp.lt.u32.totalorder %s1848_s28, %s1904_s14 }
 0x5a4   : > { %p1541_p10 = scmp.lt.u32.totalorder %s1539_s22, %s1535_s26  ;;  %p1543_p12 = scmp.lt.u32.totalorder %s1535_s26, %s1848_s28 }
 0x5a5   : > { %p1537_p7 = pnand %p1536_p4, %p1703_p5 }
 0x5a6   : > { %p1542_p11 = por %p1541_p10, %p1540_p9 }
 0x5a7   : > { %p1538_p8 = pneg %p1537_p7 }
 0x5a8   : > { %p1544_p13 = por %p1543_p12, %p1542_p11 }
 0x5aa   : > { %p1545_p0 = pnand %p1544_p13, %p1538_p8 }
 0x5ac   : > { %1548 = shalt.err (!%p1545_p0)
}
 0x5ad   : > { %1460 = dma.vmem_to_hbm [thread:$0]  (%p1703_p5), %s1850_s1, 64, %s1848_s28, %s1195_s18  }
 0x5ae PF: > { %p1466_p1 = scmp.ge.s32.totalorder %s1583_s16, 2  ;;  %s1220_s25 = sand.u32 1, %s1571_s29  }
 0x5af   : > { %s1221_s3 = scalar_lea.sflag [#allocation3], %s1220_s25 }
 0x5b0   : > { %p1463_p2 = pnand %p1466_p1, %p1707_p6 }
 0x5b2   : > { %1566 = dma.done.wait (!%p1463_p2), %s1221_s3, 64  }
 0x5b3   : > { %1568 = vsyncadd (!%p1463_p2), %s1221_s3, 4294967232  ;;  %s1914_s20 = sld [smem:[#allocation5_spill]]  ;;  %p24_p3 = scmp.ge.s32.totalorder %s1690_s19, 4  }
 0x5b4   : > { %s1915_s29 = smov %s1575_s30  ;;  %s1916_s30 = smov %s1579_s15 }
 0x5b5   : > { %s1918_s16 = smov %s1690_s19  ;;  %26 = sbr.rel (!%p24_p3) target bundleno = 7 (0x7), region = 117 }
 0x5b9   : > { %s1917_s15 = smov %s1914_s20 }
 0x5bc   :  { %1226 = vsyncpa [#allocation3], 1 }
 0x5bd   :  { %1228 = vsyncpa [#allocation3 + $0x1], 1 }

</bundles_post_ra>
